<compile_context>
chip_gen: v6e
topology: v6e:2x2x1
jax: 0.10.0
libtpu: 0.0.40
codegen_flags: <defaults>
</compile_context>

<pallas_src>
import jax
import jax.numpy as jnp
from jax.experimental import pallas as pl
from jax.experimental.pallas import tpu as pltpu


def _round_up(x, m):
    return ((x + m - 1) // m) * m


def _cls_head_kernel(cls_ref, a_ref, b_ref,
                     w1c_ref, w1a_ref, w1b_ref, b1_ref,
                     w2_ref, b2_ref, o_ref):
    """out = tanh([cls|a|b] @ W1 + b1) @ W2 + b2, concat fused as 3 partial dots."""
    # First matmul, f32 accumulation on the MXU.
    h = jnp.dot(cls_ref[...], w1c_ref[...], preferred_element_type=jnp.float32)
    h = h + jnp.dot(a_ref[...], w1a_ref[...], preferred_element_type=jnp.float32)
    h = h + jnp.dot(b_ref[...], w1b_ref[...], preferred_element_type=jnp.float32)
    # Bias + tanh in f32 (tanh goes to the EUP slot).
    h = jnp.tanh(h + b1_ref[...])
    # Second matmul, cast activations back to the compute dtype, f32 accumulate.
    o = jnp.dot(h.astype(w2_ref.dtype), w2_ref[...],
                preferred_element_type=jnp.float32)
    o_ref[...] = (o + b2_ref[...]).astype(o_ref.dtype)


def roberta_classification_head_with_srl(features, srl_a, srl_b,
                                         w_dense, b_dense,
                                         w_out, b_out,
                                         *, block_b=256,
                                         compute_dtype=jnp.bfloat16):
    """features: [B, S, H]; srl_a/srl_b: [B, E]; returns [B, num_labels]."""
    B, S, H = features.shape
    E = srl_a.shape[1]
    Hd = w_dense.shape[1]          # == hidden_size
    L = w_out.shape[1]             # num_labels
    out_dtype = features.dtype

    # ---- layout glue (cheap, stays in JAX) -------------------------------
    # CLS token slice; the concat is fused into the kernel via split W1.
    cls = features[:, 0, :]                                    # [B, H]

    # Lane-dense output: pad label dim up to a multiple of 128.
    Lp = _round_up(L, 128)
    w_out_p = jnp.pad(w_out, ((0, 0), (0, Lp - L)))            # [Hd, Lp]
    b_out_p = jnp.pad(b_out.reshape(1, L), ((0, 0), (0, Lp - L)))

    # Split dense weight into the three concat segments.
    w1_cls = w_dense[:H]                                       # [H,  Hd]
    w1_a = w_dense[H:H + E]                                    # [E,  Hd]
    w1_b = w_dense[H + E:]                                     # [E,  Hd]

    # Compute-dtype casts (matmul operands); biases stay f32.
    cls_c = cls.astype(compute_dtype)
    a_c = srl_a.astype(compute_dtype)
    b_c = srl_b.astype(compute_dtype)
    w1_cls = w1_cls.astype(compute_dtype)
    w1_a = w1_a.astype(compute_dtype)
    w1_b = w1_b.astype(compute_dtype)
    w2 = w_out_p.astype(compute_dtype)
    b1 = b_dense.reshape(1, Hd).astype(jnp.float32)
    b2 = b_out_p.astype(jnp.float32)

    # ---- batch tiling ----------------------------------------------------
    tb = block_b if B >= block_b else B
    Bp = _round_up(B, tb)
    if Bp != B:
        pad = Bp - B
        cls_c = jnp.pad(cls_c, ((0, pad), (0, 0)))
        a_c = jnp.pad(a_c, ((0, pad), (0, 0)))
        b_c = jnp.pad(b_c, ((0, pad), (0, 0)))
    grid = (Bp // tb,)

    # ---- VMEM budget / cost hints ---------------------------------------
    itemsize = jnp.dtype(compute_dtype).itemsize
    weight_bytes = (w1_cls.size + w1_a.size + w1_b.size + w2.size) * itemsize
    act_bytes = 2 * tb * (H + 2 * E) * itemsize          # double-buffered in
    out_bytes_tile = 2 * tb * Lp * jnp.dtype(out_dtype).itemsize
    vmem_est = weight_bytes + act_bytes + out_bytes_tile + (b1.size + b2.size) * 4
    vmem_limit = None
    if vmem_est > 30 * 1024 * 1024:
        # Raise the scoped-VMEM cap only when big tiles need it (keep headroom
        # for v7x's 64 MiB physical VMEM).
        vmem_limit = min(int(vmem_est * 3 // 2), 100 * 1024 * 1024)

    cost = pl.CostEstimate(
        flops=2 * Bp * (H + 2 * E) * Hd + 2 * Bp * Hd * Lp,
        transcendentals=Bp * Hd,
        bytes_accessed=int(
            (cls_c.size + a_c.size + b_c.size) * itemsize
            + weight_bytes
            + (b1.size + b2.size) * 4
            + Bp * Lp * jnp.dtype(out_dtype).itemsize),
    )

    out = pl.pallas_call(
        _cls_head_kernel,
        out_shape=jax.ShapeDtypeStruct((Bp, Lp), out_dtype),
        grid=grid,
        in_specs=[
            pl.BlockSpec((tb, H), lambda i: (i, 0)),     # cls
            pl.BlockSpec((tb, E), lambda i: (i, 0)),     # srl_a
            pl.BlockSpec((tb, E), lambda i: (i, 0)),     # srl_b
            pl.BlockSpec((H, Hd), lambda i: (0, 0)),     # W1[:H]   (resident)
            pl.BlockSpec((E, Hd), lambda i: (0, 0)),     # W1[H:H+E]
            pl.BlockSpec((E, Hd), lambda i: (0, 0)),     # W1[H+E:]
            pl.BlockSpec((1, Hd), lambda i: (0, 0)),     # b1
            pl.BlockSpec((Hd, Lp), lambda i: (0, 0)),    # W2 (padded, resident)
            pl.BlockSpec((1, Lp), lambda i: (0, 0)),     # b2 (padded)
        ],
        out_specs=pl.BlockSpec((tb, Lp), lambda i: (i, 0)),
        compiler_params=pltpu.CompilerParams(
            dimension_semantics=("parallel",),
            vmem_limit_bytes=vmem_limit),
        cost_estimate=cost,
    )(cls_c, a_c, b_c, w1_cls, w1_a, w1_b, b1, w2, b2)

    return out[:B, :L]


def _reference(features, srl_a, srl_b, w_dense, b_dense, w_out, b_out):
    x = jnp.concatenate([features[:, 0, :], srl_a, srl_b], axis=1)
    h = jnp.tanh(x @ w_dense + b_dense)
    return h @ w_out + b_out


if __name__ == "__main__":
    # Small, module-consistent shapes.
    B = 2            # batch
    S = 8            # sequence length
    H = 32           # config.hidden_size
    E = 16           # srl_embed_dim
    L = 3            # config.num_labels

    key = jax.random.PRNGKey(0)
    kf, ka, kb, kw1, kb1, kw2, kb2 = jax.random.split(key, 7)

    features = jax.random.normal(kf, (B, S, H), dtype=jnp.float32)
    srl_a = jax.random.normal(ka, (B, E), dtype=jnp.float32)
    srl_b = jax.random.normal(kb, (B, E), dtype=jnp.float32)

    # nn.Linear shapes stored transposed vs PyTorch: (in_features, out_features).
    w_dense = 0.02 * jax.random.normal(kw1, (H + 2 * E, H), dtype=jnp.float32)
    b_dense = 0.02 * jax.random.normal(kb1, (H,), dtype=jnp.float32)
    w_out = 0.02 * jax.random.normal(kw2, (H, L), dtype=jnp.float32)
    b_out = 0.02 * jax.random.normal(kb2, (L,), dtype=jnp.float32)

    ref = _reference(features, srl_a, srl_b, w_dense, b_dense, w_out, b_out)

    # Exact f32 path.
    out_f32 = roberta_classification_head_with_srl(
        features, srl_a, srl_b, w_dense, b_dense, w_out, b_out,
        compute_dtype=jnp.float32)
    out_f32 = jax.block_until_ready(out_f32)
    assert out_f32.shape == (B, L)
    assert jnp.allclose(out_f32, ref, atol=1e-5, rtol=1e-5)

    # bf16-matmul / f32-accumulate path (production default).
    out_bf16 = roberta_classification_head_with_srl(
        features, srl_a, srl_b, w_dense, b_dense, w_out, b_out,
        compute_dtype=jnp.bfloat16)
    out_bf16 = jax.block_until_ready(out_bf16)
    assert out_bf16.shape == (B, L)
    assert jnp.allclose(out_bf16, ref, atol=2e-2, rtol=2e-2)

    print("KERNEL_OK")
</pallas_src>

<mosaic_0001>
module attributes {stable_mosaic.version = 11 : i64} {
  func.func @_cls_head_kernel(%arg0: i32, %arg1: memref<2x32xf32, #tpu.memory_space<vmem>>, %arg2: memref<2x16xf32, #tpu.memory_space<vmem>>, %arg3: memref<2x16xf32, #tpu.memory_space<vmem>>, %arg4: memref<32x32xf32, #tpu.memory_space<vmem>>, %arg5: memref<16x32xf32, #tpu.memory_space<vmem>>, %arg6: memref<16x32xf32, #tpu.memory_space<vmem>>, %arg7: memref<1x32xf32, #tpu.memory_space<vmem>>, %arg8: memref<32x128xf32, #tpu.memory_space<vmem>>, %arg9: memref<1x128xf32, #tpu.memory_space<vmem>>, %arg10: memref<2x128xf32, #tpu.memory_space<vmem>>) attributes {dimension_semantics = [#tpu.dimension_semantics<parallel>], iteration_bounds = array<i64: 1>, scalar_prefetch = 0 : i64, scratch_operands = 0 : i64, tpu.core_type = #tpu.core_type<tc>, window_params = [{transform_indices = @transform_0, window_bounds = array<i64: 2, 32>}, {transform_indices = @transform_1, window_bounds = array<i64: 2, 16>}, {transform_indices = @transform_2, window_bounds = array<i64: 2, 16>}, {pipeline_mode = #tpu.pipeline_mode<synchronous>, transform_indices = @transform_3, window_bounds = array<i64: 32, 32>}, {pipeline_mode = #tpu.pipeline_mode<synchronous>, transform_indices = @transform_4, window_bounds = array<i64: 16, 32>}, {pipeline_mode = #tpu.pipeline_mode<synchronous>, transform_indices = @transform_5, window_bounds = array<i64: 16, 32>}, {pipeline_mode = #tpu.pipeline_mode<synchronous>, transform_indices = @transform_6, window_bounds = array<i64: 1, 32>}, {pipeline_mode = #tpu.pipeline_mode<synchronous>, transform_indices = @transform_7, window_bounds = array<i64: 32, 128>}, {pipeline_mode = #tpu.pipeline_mode<synchronous>, transform_indices = @transform_8, window_bounds = array<i64: 1, 128>}, {transform_indices = @transform_9, window_bounds = array<i64: 2, 128>}]} {
    %c0 = arith.constant 0 : index
    %c0_0 = arith.constant 0 : index
    %0 = vector.load %arg1[%c0, %c0_0] : memref<2x32xf32, #tpu.memory_space<vmem>>, vector<2x32xf32>
    %c0_1 = arith.constant 0 : index
    %c0_2 = arith.constant 0 : index
    %1 = vector.load %arg4[%c0_1, %c0_2] : memref<32x32xf32, #tpu.memory_space<vmem>>, vector<32x32xf32>
    %cst = arith.constant dense<0.000000e+00> : vector<2x32xf32>
    %2 = tpu.matmul %0, %1, %cst {dimension_numbers = #tpu.dot_dimension_numbers<[1], [0], [0], [1], [0, 0, 1, 1], [], []>} : vector<2x32xf32>, vector<32x32xf32>, vector<2x32xf32> -> vector<2x32xf32>
    %c0_3 = arith.constant 0 : index
    %c0_4 = arith.constant 0 : index
    %3 = vector.load %arg2[%c0_3, %c0_4] : memref<2x16xf32, #tpu.memory_space<vmem>>, vector<2x16xf32>
    %c0_5 = arith.constant 0 : index
    %c0_6 = arith.constant 0 : index
    %4 = vector.load %arg5[%c0_5, %c0_6] : memref<16x32xf32, #tpu.memory_space<vmem>>, vector<16x32xf32>
    %cst_7 = arith.constant dense<0.000000e+00> : vector<2x32xf32>
    %5 = tpu.matmul %3, %4, %cst_7 {dimension_numbers = #tpu.dot_dimension_numbers<[1], [0], [0], [1], [0, 0, 1, 1], [], []>} : vector<2x16xf32>, vector<16x32xf32>, vector<2x32xf32> -> vector<2x32xf32>
    %6 = arith.addf %2, %5 : vector<2x32xf32>
    %c0_8 = arith.constant 0 : index
    %c0_9 = arith.constant 0 : index
    %7 = vector.load %arg3[%c0_8, %c0_9] : memref<2x16xf32, #tpu.memory_space<vmem>>, vector<2x16xf32>
    %c0_10 = arith.constant 0 : index
    %c0_11 = arith.constant 0 : index
    %8 = vector.load %arg6[%c0_10, %c0_11] : memref<16x32xf32, #tpu.memory_space<vmem>>, vector<16x32xf32>
    %cst_12 = arith.constant dense<0.000000e+00> : vector<2x32xf32>
    %9 = tpu.matmul %7, %8, %cst_12 {dimension_numbers = #tpu.dot_dimension_numbers<[1], [0], [0], [1], [0, 0, 1, 1], [], []>} : vector<2x16xf32>, vector<16x32xf32>, vector<2x32xf32> -> vector<2x32xf32>
    %10 = arith.addf %6, %9 : vector<2x32xf32>
    %c0_13 = arith.constant 0 : index
    %c0_14 = arith.constant 0 : index
    %11 = vector.load %arg7[%c0_13, %c0_14] : memref<1x32xf32, #tpu.memory_space<vmem>>, vector<1x32xf32>
    %12 = vector.broadcast %11 : vector<1x32xf32> to vector<2x32xf32>
    %13 = arith.addf %10, %12 : vector<2x32xf32>
    %14 = math.tanh %13 : vector<2x32xf32>
    %c0_15 = arith.constant 0 : index
    %c0_16 = arith.constant 0 : index
    %15 = vector.load %arg8[%c0_15, %c0_16] : memref<32x128xf32, #tpu.memory_space<vmem>>, vector<32x128xf32>
    %cst_17 = arith.constant dense<0.000000e+00> : vector<2x128xf32>
    %16 = tpu.matmul %14, %15, %cst_17 {dimension_numbers = #tpu.dot_dimension_numbers<[1], [0], [0], [1], [0, 0, 1, 1], [], []>} : vector<2x32xf32>, vector<32x128xf32>, vector<2x128xf32> -> vector<2x128xf32>
    %c0_18 = arith.constant 0 : index
    %c0_19 = arith.constant 0 : index
    %17 = vector.load %arg9[%c0_18, %c0_19] : memref<1x128xf32, #tpu.memory_space<vmem>>, vector<1x128xf32>
    %18 = vector.broadcast %17 : vector<1x128xf32> to vector<2x128xf32>
    %19 = arith.addf %16, %18 : vector<2x128xf32>
    %c0_20 = arith.constant 0 : index
    %c0_21 = arith.constant 0 : index
    %20 = vector.load %arg10[%c0_20, %c0_21] : memref<2x128xf32, #tpu.memory_space<vmem>>, vector<2x128xf32>
    tpu.vector_store %arg10[%c0_20, %c0_21], %19 {strides = array<i32>} : memref<2x128xf32, #tpu.memory_space<vmem>>, vector<2x128xf32>,
    return
  }
  func.func @transform_0(%arg0: i32) -> (i32, i32) {
    %c0_i32 = arith.constant 0 : i32
    %c0_i32_0 = arith.constant 0 : i32
    return %arg0, %c0_i32 : i32, i32
  }
  func.func @transform_1(%arg0: i32) -> (i32, i32) {
    %c0_i32 = arith.constant 0 : i32
    %c0_i32_0 = arith.constant 0 : i32
    return %arg0, %c0_i32 : i32, i32
  }
  func.func @transform_2(%arg0: i32) -> (i32, i32) {
    %c0_i32 = arith.constant 0 : i32
    %c0_i32_0 = arith.constant 0 : i32
    return %arg0, %c0_i32 : i32, i32
  }
  func.func @transform_3(%arg0: i32) -> (i32, i32) {
    %c0_i32 = arith.constant 0 : i32
    %c0_i32_0 = arith.constant 0 : i32
    %c0_i32_1 = arith.constant 0 : i32
    return %c0_i32, %c0_i32_0 : i32, i32
  }
  func.func @transform_4(%arg0: i32) -> (i32, i32) {
    %c0_i32 = arith.constant 0 : i32
    %c0_i32_0 = arith.constant 0 : i32
    %c0_i32_1 = arith.constant 0 : i32
    return %c0_i32, %c0_i32_0 : i32, i32
  }
  func.func @transform_5(%arg0: i32) -> (i32, i32) {
    %c0_i32 = arith.constant 0 : i32
    %c0_i32_0 = arith.constant 0 : i32
    %c0_i32_1 = arith.constant 0 : i32
    return %c0_i32, %c0_i32_0 : i32, i32
  }
  func.func @transform_6(%arg0: i32) -> (i32, i32) {
    %c0_i32 = arith.constant 0 : i32
    %c0_i32_0 = arith.constant 0 : i32
    %c0_i32_1 = arith.constant 0 : i32
    return %c0_i32, %c0_i32_0 : i32, i32
  }
  func.func @transform_7(%arg0: i32) -> (i32, i32) {
    %c0_i32 = arith.constant 0 : i32
    %c0_i32_0 = arith.constant 0 : i32
    %c0_i32_1 = arith.constant 0 : i32
    return %c0_i32, %c0_i32_0 : i32, i32
  }
  func.func @transform_8(%arg0: i32) -> (i32, i32) {
    %c0_i32 = arith.constant 0 : i32
    %c0_i32_0 = arith.constant 0 : i32
    %c0_i32_1 = arith.constant 0 : i32
    return %c0_i32, %c0_i32_0 : i32, i32
  }
  func.func @transform_9(%arg0: i32) -> (i32, i32) {
    %c0_i32 = arith.constant 0 : i32
    %c0_i32_0 = arith.constant 0 : i32
    return %arg0, %c0_i32 : i32, i32
  }
}

</mosaic_0001>

<bundles_post_ra>
// kernel: tpu_custom_call.1
= control target key start
LH: loop header
LB: loop body
LE: loop exit
PB: predicated region body
PF: predicated region fallthrough
CT: control target
= control target key end

     0   :  { %14 = vsyncpa [#allocation3], 0  ;;  %s788_s0 = inlined_call_operand.hbm [shape: f32[2,32], index: 0, kind: input, shape index: {}]   ;;  %s789_s1 = inlined_call_operand.hbm [shape: f32[2,16], index: 1, kind: input, shape index: {}]   ;;  %s790_s2 = inlined_call_operand.vmem [shape: f32[2,16], index: 2, kind: input, shape index: {}]   ;;  %s791_s3 = inlined_call_operand.hbm [shape: f32[32,32], index: 3, kind: input, shape index: {}]   ;;  %s792_s4 = inlined_call_operand.hbm [shape: f32[16,32], index: 4, kind: input, shape index: {}]   ;;  %s793_s5 = inlined_call_operand.hbm [shape: f32[16,32], index: 5, kind: input, shape index: {}]   ;;  %s794_s6 = inlined_call_operand.vmem [shape: f32[1,32], index: 6, kind: input, shape index: {}]   ;;  %s795_s7 = inlined_call_operand.hbm [shape: f32[32,128], index: 7, kind: input, shape index: {}]   ;;  %s796_s8 = inlined_call_operand.vmem [shape: f32[1,128], index: 8, kind: input, shape index: {}]   ;;  %s797_s9 = inlined_call_operand.hbm [shape: f32[2,128], index: 9, kind: output, shape index: {}]  }
   0x1   :  { %15 = vsyncpa [#allocation6], 0 }
   0x2   :  { %16 = vsyncpa [#allocation9], 0 }
   0x3   :  { %17 = vsyncpa [#allocation12], 0 }
   0x4   :  { %18 = vsyncpa [#allocation4], 0  ;;  %s677_s30 = smov [#allocation5]  }
   0x5   :  { %s35_s10 = sshll.u32 %s677_s30, 4  ;;  %s36_s10 = int_to_ptr.vmem [resolvable:$true] %s35_s10 }
   0x6   :  { %s535_s11 = scalar_lea.vmem %s36_s10, 32  ;;  %p540_p1 = scmp.lt.s32.totalorder %s36_s10, %s36_s10 }
   0x7   :  { %p536_p0 = scmp.ne.s32.totalorder %s36_s10, %s535_s11  ;;  %p541_p2 = scmp.lt.s32.totalorder %s535_s11, %s535_s11 }
   0x9   :  { %p542_p3 = por %p541_p2, %p540_p1 }
   0xb   :  { %p543_p4 = pnand %p542_p3, %p536_p0 }
   0xd   :  { %546 = shalt.err (!%p543_p4)
}
   0xe   :  { %38 = dma.hbm_to_vmem [thread:$0]  %s789_s1, 32, %s36_s10, [#allocation6]  }
   0xf   :  { %s678_s14 = smov [#allocation8]   ;;  %s679_s16 = smov [#allocation2]  }
  0x10   :  { %s58_s15 = sshll.u32 %s678_s14, 4  ;;  %s25_s17 = sshll.u32 %s679_s16, 4  ;;  %s59_s15 = int_to_ptr.vmem [resolvable:$true] %s58_s15  ;;  %s26_s17 = int_to_ptr.vmem [resolvable:$true] %s25_s17 }
  0x11   :  { %s555_s18 = scalar_lea.vmem %s59_s15, 256  ;;  %p560_p6 = scmp.lt.s32.totalorder %s59_s15, %s59_s15 }
  0x12   :  { %p556_p5 = scmp.ne.s32.totalorder %s59_s15, %s555_s18  ;;  %p561_p7 = scmp.lt.s32.totalorder %s555_s18, %s555_s18 }
  0x14   :  { %p562_p8 = por %p561_p7, %p560_p6 }
  0x16   :  { %p563_p9 = pnand %p562_p8, %p556_p5 }
  0x18   :  { %566 = shalt.err (!%p563_p9)
}
  0x19   :  { %s680_s19 = smov 128   ;;  %s681_s20 = smov 8  }
  0x1a   :  { %64 = dma.hbm_to_vmem [thread:$0]  %s792_s4, 256, %s59_s15, [#allocation9], %s680_s19, %s680_s19, %s681_s20  }
  0x1b   :  { %s575_s1 = scalar_lea.vmem %s26_s17, 32  ;;  %p580_p11 = scmp.lt.s32.totalorder %s26_s17, %s26_s17 }
  0x1c   :  { %p576_p10 = scmp.ne.s32.totalorder %s26_s17, %s575_s1  ;;  %p581_p12 = scmp.lt.s32.totalorder %s575_s1, %s575_s1 }
  0x1e   :  { %p582_p13 = por %p581_p12, %p580_p11 }
  0x20   :  { %p583_p0 = pnand %p582_p13, %p576_p10 }
  0x22   :  { %586 = shalt.err (!%p583_p0)
}
  0x23   :  { %28 = dma.hbm_to_vmem [thread:$0]  %s788_s0, 32, %s26_s17, [#allocation3]  }
  0x24   :  { %s682_s25 = smov [#allocation7]   ;;  %s683_s27 = smov [#allocation10]  }
  0x25   :  { %s46_s26 = sshll.u32 %s682_s25, 4  ;;  %s70_s28 = sshll.u32 %s683_s27, 4  ;;  %s47_s26 = int_to_ptr.vmem [resolvable:$true] %s46_s26  ;;  %s71_s28 = int_to_ptr.vmem [resolvable:$true] %s70_s28 }
  0x26   :  { %s595_s29 = scalar_lea.vmem %s47_s26, 512  ;;  %p600_p2 = scmp.lt.s32.totalorder %s47_s26, %s47_s26 }
  0x27   :  { %p596_p1 = scmp.ne.s32.totalorder %s47_s26, %s595_s29  ;;  %p601_p3 = scmp.lt.s32.totalorder %s595_s29, %s595_s29 }
  0x29   :  { %p602_p4 = por %p601_p3, %p600_p2 }
  0x2b   :  { %p603_p5 = pnand %p602_p4, %p596_p1 }
  0x2d   :  { %606 = shalt.err (!%p603_p5)
}
  0x2e   :  { %52 = dma.hbm_to_vmem [thread:$0]  %s791_s3, 512, %s47_s26, [#allocation6], %s680_s19, %s680_s19, %s681_s20  }
  0x2f   :  { %s615_s0 = scalar_lea.vmem %s71_s28, 256  ;;  %p620_p7 = scmp.lt.s32.totalorder %s71_s28, %s71_s28 }
  0x30   :  { %p616_p6 = scmp.ne.s32.totalorder %s71_s28, %s615_s0  ;;  %p621_p8 = scmp.lt.s32.totalorder %s615_s0, %s615_s0 }
  0x32   :  { %p622_p9 = por %p621_p8, %p620_p7 }
  0x34   :  { %p623_p10 = pnand %p622_p9, %p616_p6 }
  0x36   :  { %626 = shalt.err (!%p623_p10)
}
  0x37   :  { %76 = dma.hbm_to_vmem [thread:$0]  %s793_s5, 256, %s71_s28, [#allocation9], %s680_s19, %s680_s19, %s681_s20  }
  0x38   :  { %s684_s12 = smov [#allocation11]  }
  0x39   :  { %s84_s13 = sshll.u32 %s684_s12, 4  ;;  %s85_s13 = int_to_ptr.vmem [resolvable:$true] %s84_s13 }
  0x3a   :  { %s635_s14 = scalar_lea.vmem %s85_s13, 512  ;;  %p640_p12 = scmp.lt.s32.totalorder %s85_s13, %s85_s13 }
  0x3b   :  { %p636_p11 = scmp.ne.s32.totalorder %s85_s13, %s635_s14  ;;  %p641_p13 = scmp.lt.s32.totalorder %s635_s14, %s635_s14 }
  0x3d   :  { %p642_p0 = por %p641_p13, %p640_p12 }
  0x3f   :  { %p643_p1 = pnand %p642_p0, %p636_p11 }
  0x41   :  { %646 = shalt.err (!%p643_p1)
}
  0x42   :  { %90 = dma.hbm_to_vmem [thread:$0]  %s795_s7, 512, %s85_s13, [#allocation12], %s680_s19, %s680_s19, %s681_s20  }
  0x43   :  { %667 = dma.done.wait [#allocation3], 32  }
  0x44   :  { %668 = vsyncadd [#allocation3], 4294967264 }
  0x45   :  { %669 = dma.done.wait [#allocation6], 544  }
  0x46   :  { %670 = vsyncadd [#allocation6], 4294966752 }
  0x47   :  { %671 = dma.done.wait [#allocation9], 512  }
  0x48   :  { %672 = vsyncadd [#allocation9], 4294966784 }
  0x49   :  { %673 = dma.done.wait [#allocation12], 512  }
  0x4a   :  { %674 = vsyncadd [#allocation12], 4294966784  ;;  %v685_v0 = vmov 0.0   ;;  %vm686_vm0 = vmmov 0   ;;  %v118_v1 = vld [vmem:[#allocation8 + $0x8] sm:$0xff]  ;;  %v117_v2 = vld [vmem:[#allocation8] sm:$0xff] }
  0x4b   :  { %478 = vmatprep.subr.mxu1 %v685_v0  ;;  %482 = vmatprep.mubr.msk.f32.mxu1 %vm686_vm0, %v685_v0  ;;  %v116_v3 = vld [vmem:[#allocation5] sm:$0x3]  ;;  %vm119_vm1 = vcmask 130048   ;;  %v114_v6 = vld [vmem:[#allocation7 + $0x10] sm:$0xff]  ;;  %v267_v8 = vld [vmem:[%s790_s2] sm:$0x3] }
  0x4c   :  { %496 = vmatprep.subr.mxu0 %v685_v0  ;;  %500 = vmatprep.mubr.msk.f32.mxu0 %vm686_vm0, %v685_v0  ;;  %v115_v4 = vld [vmem:[#allocation7 + $0x18] sm:$0xff]  ;;  %v268_v7 = vld [vmem:[#allocation10] sm:$0xff]  ;;  %v113_v9 = vld [vmem:[#allocation7 + $0x8] sm:$0xff]  ;;  %vm193_vm2 = vcmask 261120   ;;  %s687_s19 = smov [#allocation13]  }
  0x4d   :  { %479 = vmatpush3.msra.mxu1 %v118_v1  ;;  %v269_v5 = vld [vmem:[#allocation10 + $0x8] sm:$0xff]  ;;  %v112_v10 = vld [vmem:[#allocation7] sm:$0xff]  ;;  %v355_v13 = vld [vmem:[#allocation11 + $0x10] sm:$0xff]  ;;  %s444_s20 = sshll.u32 %s687_s19, 4  ;;  %s445_s20 = int_to_ptr.vmem [resolvable:$true] %s444_s20 }
  0x4e   :  { %480 = vmatprep.subr.mxu1 %v685_v0  ;;  %497 = vmatpush3.msra.mxu0 %v269_v5  ;;  %v111_v11 = vld [vmem:[#allocation2] sm:$0x3]  ;;  %v354_v14 = vld [vmem:[#allocation11 + $0x8] sm:$0xff]  ;;  %v353_v15 = vld [vmem:[#allocation11] sm:$0xff]  ;;  %s647_s21 = scalar_lea.vmem %s445_s20, 32  ;;  %p652_p3 = scmp.lt.s32.totalorder %s445_s20, %s445_s20 }
  0x4f   :  { %481 = vmatpush3.msra.mxu1 %v117_v2  ;;  %498 = vmatprep.subr.mxu0 %v685_v0  ;;  %v356_v12 = vld [vmem:[#allocation11 + $0x18] sm:$0xff]  ;;  %p648_p2 = scmp.ne.s32.totalorder %s445_s20, %s647_s21  ;;  %p653_p4 = scmp.lt.s32.totalorder %s647_s21, %s647_s21 }
  0x50   :  { %483 = vmatmul.mubr.msk.f32.vlgmr.msra.gmra.mxu1 %vm119_vm1, %v116_v3  ;;  %485 = vmatprep.subr.mxu1 %v685_v0  ;;  %v459_v22 = vld [vmem:[%s794_s6] ss:$0 sm:$0xff] }
  0x51   :  { %486 = vmatpush3.msra.mxu1 %v115_v4  ;;  %493 = vmatprep.mubr.msk.f32.mxu1 %vm686_vm0, %v685_v0  ;;  %v460_v27 = vld [vmem:[%s796_s8] ss:$0 sm:$0xff]  ;;  %p654_p5 = por %p653_p4, %p652_p3 }
  0x52   :  { %487 = vmatprep.subr.mxu1 %v685_v0  ;;  %499 = vmatpush3.msra.mxu0 %v268_v7 }
  0x53   :  { %488 = vmatpush3.msra.mxu1 %v114_v6  ;;  %501 = vmatmul.mubr.msk.f32.vlgmr.msra.gmra.mxu0 %vm119_vm1, %v267_v8  ;;  %p655_p6 = pnand %p654_p5, %p648_p2 }
  0x54   :  { %489 = vmatprep.subr.mxu1 %v685_v0  ;;  %503 = vmatprep.subr.mxu0 %v685_v0 }
  0x55   :  { %490 = vmatpush3.msra.mxu1 %v113_v9  ;;  %511 = vmatprep.mubr.msk.f32.mxu0 %vm686_vm0, %v685_v0 }
  0x56   :  { %491 = vmatprep.subr.mxu1 %v685_v0  ;;  %504 = vmatpush3.msra.mxu0 %v356_v12 }
  0x57   :  { %492 = vmatpush3.msra.mxu1 %v112_v10  ;;  %505 = vmatprep.subr.mxu0 %v685_v0 }
  0x58   :  { %494 = vmatmul.mubr.msk.f32.vlgmr.msra.gmra.mxu1 %vm193_vm2, %v111_v11  ;;  %506 = vmatpush3.msra.mxu0 %v355_v13 }
  0x59   :  { %507 = vmatprep.subr.mxu0 %v685_v0 }
  0x5a   :  { %508 = vmatpush3.msra.mxu0 %v354_v14 }
  0x5b   :  { %509 = vmatprep.subr.mxu0 %v685_v0 }
  0x5c   :  { %510 = vmatpush3.msra.mxu0 %v353_v15 }
 0x110   :  { %v189_v16 = vpop.f32.mrf.mxu1 }
 0x112   :  { %v484_v17 = vpop.f32.mrf.mxu1 }
 0x113   :  { %v339_v18 = vpop.f32.mrf.mxu0 }
 0x115   :  { %v502_v19 = vpop.f32.mrf.mxu0 }
 0x118   :  { %v263_v20 = vpop.f32.mrf.mxu1 }
 0x119   :  { %v264_v21 = vadd.f32 %v263_v20, %v189_v16 }
 0x11a   :  { %v495_v23 = vpop.f32.mrf.mxu1 }
 0x11b   :  { %v343_v24 = vadd.f32 %v339_v18, %v264_v21 }
 0x11d   :  { %v351_v25 = vadd.f32 %v459_v22, %v343_v24 }
 0x11f   :  { %525 = vtanh.f32 %v351_v25 }
 0x12c   :  { %v526_v26 = vpop.eup %525 }
 0x12d   :  { %512 = vmatmul.mubr.msk.f32.vlgmr.msra.gmra.mxu0 %vm193_vm2, %v526_v26 }
 0x1ed   :  { %v433_v28 = vpop.f32.mrf.mxu0 }
 0x1ee   :  { %v434_v29 = vadd.f32 %v460_v27, %v433_v28 }
 0x1ef   :  { %v513_v30 = vpop.f32.mrf.mxu0 }
 0x1f0   :  { %437 = vst [vmem:[#allocation13] sm:$0x3] %v434_v29 }
 0x1f1   :  { %658 = shalt.err (!%p655_p6)
}
 0x1f2   :  { %447 = dma.vmem_to_hbm [thread:$0]  %s445_s20, 32, %s797_s9, [#allocation4]  }
 0x1f3   :  { %675 = dma.done.wait [#allocation4], 32  }
 0x1f4   :  { %676 = vsyncadd [#allocation4], 4294967264 }
 0x1f5   :  { %451 = vsyncpa [#allocation3], 1 }
 0x1f6   :  { %452 = vsyncpa [#allocation6], 1 }
 0x1f7   :  { %453 = vsyncpa [#allocation9], 1 }
 0x1f8   :  { %454 = vsyncpa [#allocation12], 1 }
 0x1f9   :  { %455 = vsyncpa [#allocation4], 1 }

</bundles_post_ra>
